<compile_context>
chip_gen: v7x
topology: tpu7x:2x2x1
jax: 0.10.0
libtpu: 0.0.40
codegen_flags: <defaults>
</compile_context>

<pallas_src>
import functools
import numpy as np
import jax
import jax.numpy as jnp
from jax import lax
from jax.experimental import pallas as pl
from jax.experimental.pallas import tpu as pltpu

EPS = 1e-5


# ------------------------------ Pallas kernel -------------------------------

def _residual_block_kernel(x_ref, mask_ref, vec_ref, w1_ref, w2_ref, wcat_ref,
                           o_ref, *, W, L, Cin, Cmid, use_conv4, matmul_dtype):
    """One packed group of images per grid step.
    Layout: channels on sublanes, packed flattened spatial (L = P*H*W) on
    lanes (lane-dense)."""
    f32 = jnp.float32
    mdt = matmul_dtype

    def mm(w, a):  # MXU matmul with optional bf16 operand cast, f32 accumulate
        return jnp.dot(w.astype(mdt), a.astype(mdt), preferred_element_type=f32)

    x = x_ref[0]                                            # (Cin, L)

    # Coalesced scale/bias vector: [s1 | b1 | b2 | b3] on sublanes.
    s1 = vec_ref[0:Cin]
    b1 = vec_ref[Cin:2 * Cin]
    b2 = vec_ref[2 * Cin:2 * Cin + Cmid]
    b3 = vec_ref[2 * Cin + Cmid:2 * Cin + 2 * Cmid]

    # bn1 (eval-mode, folded) + ReLU -> feeds conv1 AND the conv4 residual path
    out1 = jnp.maximum(x * s1 + b1, 0.0)                    # (Cin, L)

    # conv1 (1x1) with bn2's scale pre-folded into the weight rows, +bias+ReLU
    a = jnp.maximum(mm(w1_ref[...], out1) + b2, 0.0)        # (Cmid, L)

    # conv2 (3x3, pad=1, stride 1) as ONE matmul over the stacked rolled taps.
    # Zero-padding (and cross-image isolation of the packed lane axis) is a
    # single multiply by the pre-broadcast 0/1 mask stack.
    taps = []
    for dh in (-1, 0, 1):
        for dw in (-1, 0, 1):
            if dh == 0 and dw == 0:
                taps.append(a)                              # center tap
            else:
                taps.append(pltpu.roll(a, shift=(-(dh * W + dw)) % L, axis=1))
    stack = jnp.concatenate(taps, axis=0) * mask_ref[...]   # (9*Cmid, L)
    b = jnp.maximum(mm(w2_ref[...], stack) + b3, 0.0)       # bn3 + ReLU

    # conv3 (+ conv4 residual, fused into a single matmul when needed)
    if use_conv4:
        out = mm(wcat_ref[...], jnp.concatenate([b, out1], axis=0))
    else:
        out = mm(wcat_ref[...], b) + x

    o_ref[0] = out


# --------------------------------- wrapper ----------------------------------

def _num_grid_steps(batch):
    """One grid step per TensorCore: 2 on dual-TC v7x, else 1 (whole batch
    packed onto lanes -- no per-step overhead on single-TC v5e/v6e)."""
    try:
        kind = jax.devices()[0].device_kind.lower()
    except Exception:
        kind = ""
    if "v7" in kind and batch % 2 == 0:
        return 2
    return 1


def _boundary_mask_stack(H, W, P, Cmid):
    """(9*Cmid, P*H*W) float32 0/1 mask, pre-broadcast to tap-stack layout.
    1 where the shifted tap lies inside its own image (zero-padding + no
    leakage between images packed on the lane axis)."""
    idx = np.arange(H * W)
    h, w = idx // W, idx % W
    rows = []
    for dh in (-1, 0, 1):
        for dw in (-1, 0, 1):
            valid = ((h + dh >= 0) & (h + dh < H) &
                     (w + dw >= 0) & (w + dw < W)).astype(np.float32)
            per_image = np.tile(valid, P)                    # (P*H*W,)
            rows.append(np.broadcast_to(per_image, (Cmid, P * H * W)))
    return np.concatenate(rows, axis=0)                      # (9*Cmid, P*H*W)


def residual_block(x_nchw, params, *, stride=1, steps=None,
                   matmul_dtype=jnp.float32):
    # TODO(synk): only stride=1 is implemented; stride>1 would additionally
    # subsample the conv2 / conv4 outputs spatially.
    assert stride == 1
    N, Cin, H, W = x_nchw.shape
    Cmid = params["w1p"].shape[0]
    Cout = params["wcat"].shape[0]
    use_conv4 = (Cin != Cout) or (stride != 1)
    # sublane-aligned static slices of the coalesced scale/bias vector
    assert Cin % 8 == 0 and Cmid % 8 == 0

    if steps is None:
        steps = _num_grid_steps(N)
    assert N % steps == 0
    P = N // steps                      # images packed on the lane axis
    HW = H * W
    L = P * HW

    # (N, Cin, H, W) -> (steps, Cin, P*HW): channels on sublanes, packed
    # flattened spatial on lanes (lane-dense output stores, unmasked).
    x2d = (x_nchw.reshape(steps, P, Cin, HW).transpose(0, 2, 1, 3)
           .reshape(steps, Cin, L).astype(jnp.float32))
    masks = jnp.asarray(_boundary_mask_stack(H, W, P, Cmid))

    vec_rows = params["vec"].shape[0]
    Kc = params["wcat"].shape[1]

    kernel = functools.partial(_residual_block_kernel, W=W, L=L, Cin=Cin,
                               Cmid=Cmid, use_conv4=use_conv4,
                               matmul_dtype=matmul_dtype)

    # TODO(synk): at real ResNet sizes on v7x (64 MiB VMEM), add lane-axis
    # spatial tiling with a 1-row halo and set vmem_limit_bytes.
    out2d = pl.pallas_call(
        kernel,
        out_shape=jax.ShapeDtypeStruct((steps, Cout, L), jnp.float32),
        grid=(steps,),
        in_specs=[
            pl.BlockSpec((1, Cin, L), lambda n: (n, 0, 0)),       # x (packed)
            pl.BlockSpec((9 * Cmid, L), lambda n: (0, 0)),        # tap masks
            pl.BlockSpec((vec_rows, 1), lambda n: (0, 0)),        # s1|b1|b2|b3
            pl.BlockSpec((Cmid, Cin), lambda n: (0, 0)),          # w1 * s2
            pl.BlockSpec((Cmid, 9 * Cmid), lambda n: (0, 0)),     # w2 * s3
            pl.BlockSpec((Cout, Kc), lambda n: (0, 0)),           # [w3 | w4]
        ],
        out_specs=pl.BlockSpec((1, Cout, L), lambda n: (n, 0, 0)),
        compiler_params=pltpu.CompilerParams(
            dimension_semantics=("parallel",)),   # v7x: one step per TensorCore
    )(x2d, masks, params["vec"], params["w1p"], params["w2p"], params["wcat"])

    return (out2d.reshape(steps, Cout, P, HW).transpose(0, 2, 1, 3)
            .reshape(N, Cout, H, W))


# --------------------------- parameter construction -------------------------

def init_params(key, Cin, Cout, stride=1):
    Cmid = Cout // 4
    ks = iter(jax.random.split(key, 32))

    def bn_fold(c):
        gamma = jax.random.uniform(next(ks), (c,), minval=0.5, maxval=1.5)
        beta = jax.random.normal(next(ks), (c,)) * 0.1
        mean = jax.random.normal(next(ks), (c,)) * 0.1
        var = jax.random.uniform(next(ks), (c,), minval=0.5, maxval=1.5)
        s = gamma / jnp.sqrt(var + EPS)
        b = beta - mean * s
        return s.astype(jnp.float32), b.astype(jnp.float32)

    def conv_w(cout, cin, k):
        fan_in = cin * k * k
        return (jax.random.normal(next(ks), (cout, cin, k, k))
                / np.sqrt(fan_in)).astype(jnp.float32)

    s1, b1 = bn_fold(Cin)
    s2, b2 = bn_fold(Cmid)
    s3, b3 = bn_fold(Cmid)
    w1_4d = conv_w(Cmid, Cin, 1)
    w2_4d = conv_w(Cmid, Cmid, 3)
    w3_4d = conv_w(Cout, Cmid, 1)
    w4_4d = conv_w(Cout, Cin, 1)

    # ---- kernel-layout / folded parameters (free at param-prep time) -------
    # bn2 / bn3 scales folded into the matmul weight rows; 3x3 weight
    # flattened tap-major to (Cmid, 9*Cmid) so conv2 is a single matmul over
    # the rolled-tap stack; conv3|conv4 concatenated for the fused matmul.
    w1p = s2[:, None] * w1_4d[:, :, 0, 0]                             # (Cmid, Cin)
    w2_flat = jnp.transpose(w2_4d, (0, 2, 3, 1)).reshape(Cmid, 9 * Cmid)
    w2p = s3[:, None] * w2_flat                                       # (Cmid, 9*Cmid)
    use_conv4 = (Cin != Cout) or (stride != 1)
    if use_conv4:
        wcat = jnp.concatenate([w3_4d[:, :, 0, 0], w4_4d[:, :, 0, 0]], axis=1)
    else:
        wcat = w3_4d[:, :, 0, 0]
    vec = jnp.concatenate([s1, b1, b2, b3]).reshape(-1, 1)            # (2Cin+2Cmid, 1)

    return dict(
        vec=vec, w1p=w1p, w2p=w2p, wcat=wcat,
        # raw parameters (for the pure-JAX reference check)
        s1=s1, b1=b1, s2=s2, b2=b2, s3=s3, b3=b3,
        w1_4d=w1_4d, w2_4d=w2_4d, w3_4d=w3_4d, w4_4d=w4_4d)


# ------------------------------ reference (JAX) ------------------------------

def residual_block_ref(x, p, *, stride=1):
    hi = lax.Precision.HIGHEST
    dn = ("NCHW", "OIHW", "NCHW")

    def bn(z, s, b):
        c = s.shape[0]
        return z * s.reshape(1, c, 1, 1) + b.reshape(1, c, 1, 1)

    out1 = jnp.maximum(bn(x, p["s1"], p["b1"]), 0.0)
    out = lax.conv_general_dilated(out1, p["w1_4d"], (1, 1), "VALID",
                                   dimension_numbers=dn, precision=hi)
    out = jnp.maximum(bn(out, p["s2"], p["b2"]), 0.0)
    out = lax.conv_general_dilated(out, p["w2_4d"], (stride, stride),
                                   ((1, 1), (1, 1)),
                                   dimension_numbers=dn, precision=hi)
    out = jnp.maximum(bn(out, p["s3"], p["b3"]), 0.0)
    out = lax.conv_general_dilated(out, p["w3_4d"], (1, 1), "VALID",
                                   dimension_numbers=dn, precision=hi)
    Cin, Cout = x.shape[1], p["w3_4d"].shape[0]
    if Cin != Cout or stride != 1:
        residual = lax.conv_general_dilated(out1, p["w4_4d"],
                                            (stride, stride), "VALID",
                                            dimension_numbers=dn, precision=hi)
    else:
        residual = x
    return out + residual


# ----------------------------------- main ------------------------------------

if __name__ == "__main__":
    N, Cin, Cout, H, W = 2, 16, 32, 16, 16    # bottleneck width = Cout // 4 = 8
    key = jax.random.PRNGKey(0)
    pkey, xkey = jax.random.split(key)
    params = init_params(pkey, Cin, Cout)
    x = jax.random.normal(xkey, (N, Cin, H, W), dtype=jnp.float32)

    fwd = jax.jit(residual_block)
    out = fwd(x, params)
    jax.block_until_ready(out)
    assert out.shape == (N, Cout, H, W) and out.dtype == jnp.float32

    ref = residual_block_ref(x, params)
    np.testing.assert_allclose(np.asarray(out), np.asarray(ref),
                               rtol=5e-3, atol=5e-3)
    print("KERNEL_OK")
</pallas_src>

<mosaic_0001>
module attributes {stable_mosaic.version = 11 : i64} {
  func.func @_residual_block_kernel(%arg0: i32, %arg1: memref<1x16x512xf32, #tpu.memory_space<vmem>>, %arg2: memref<72x512xf32, #tpu.memory_space<vmem>>, %arg3: memref<48x1xf32, #tpu.memory_space<vmem>>, %arg4: memref<8x16xf32, #tpu.memory_space<vmem>>, %arg5: memref<8x72xf32, #tpu.memory_space<vmem>>, %arg6: memref<32x24xf32, #tpu.memory_space<vmem>>, %arg7: memref<1x32x512xf32, #tpu.memory_space<vmem>>) attributes {dimension_semantics = [#tpu.dimension_semantics<parallel>], iteration_bounds = array<i64: 1>, scalar_prefetch = 0 : i64, scratch_operands = 0 : i64, tpu.core_type = #tpu.core_type<tc>, window_params = [{transform_indices = @transform_0, window_bounds = array<i64: 1, 16, 512>}, {pipeline_mode = #tpu.pipeline_mode<synchronous>, transform_indices = @transform_1, window_bounds = array<i64: 72, 512>}, {pipeline_mode = #tpu.pipeline_mode<synchronous>, transform_indices = @transform_2, window_bounds = array<i64: 48, 1>}, {pipeline_mode = #tpu.pipeline_mode<synchronous>, transform_indices = @transform_3, window_bounds = array<i64: 8, 16>}, {pipeline_mode = #tpu.pipeline_mode<synchronous>, transform_indices = @transform_4, window_bounds = array<i64: 8, 72>}, {pipeline_mode = #tpu.pipeline_mode<synchronous>, transform_indices = @transform_5, window_bounds = array<i64: 32, 24>}, {transform_indices = @transform_6, window_bounds = array<i64: 1, 32, 512>}]} {
    %c0 = arith.constant 0 : index
    %c0_0 = arith.constant 0 : index
    %c0_1 = arith.constant 0 : index
    %0 = vector.load %arg1[%c0, %c0_0, %c0_1] : memref<1x16x512xf32, #tpu.memory_space<vmem>>, vector<1x16x512xf32>
    %1 = vector.shape_cast %0 : vector<1x16x512xf32> to vector<16x512xf32>
    %c0_2 = arith.constant 0 : index
    %c0_3 = arith.constant 0 : index
    %2 = vector.load %arg3[%c0_2, %c0_3] : memref<48x1xf32, #tpu.memory_space<vmem>>, vector<16x1xf32>
    %c16 = arith.constant 16 : index
    %c0_4 = arith.constant 0 : index
    %3 = vector.load %arg3[%c16, %c0_4] : memref<48x1xf32, #tpu.memory_space<vmem>>, vector<16x1xf32>
    %c32 = arith.constant 32 : index
    %c0_5 = arith.constant 0 : index
    %4 = vector.load %arg3[%c32, %c0_5] : memref<48x1xf32, #tpu.memory_space<vmem>>, vector<8x1xf32>
    %c40 = arith.constant 40 : index
    %c0_6 = arith.constant 0 : index
    %5 = vector.load %arg3[%c40, %c0_6] : memref<48x1xf32, #tpu.memory_space<vmem>>, vector<8x1xf32>
    %6 = vector.broadcast %2 : vector<16x1xf32> to vector<16x512xf32>
    %7 = arith.mulf %1, %6 : vector<16x512xf32>
    %8 = vector.broadcast %3 : vector<16x1xf32> to vector<16x512xf32>
    %9 = arith.addf %7, %8 : vector<16x512xf32>
    %cst = arith.constant 0.000000e+00 : f32
    %10 = vector.broadcast %cst : f32 to vector<16x512xf32>
    %11 = arith.maximumf %9, %10 : vector<16x512xf32>
    %c0_7 = arith.constant 0 : index
    %c0_8 = arith.constant 0 : index
    %12 = vector.load %arg4[%c0_7, %c0_8] : memref<8x16xf32, #tpu.memory_space<vmem>>, vector<8x16xf32>
    %cst_9 = arith.constant dense<0.000000e+00> : vector<8x512xf32>
    %13 = tpu.matmul %12, %11, %cst_9 {dimension_numbers = #tpu.dot_dimension_numbers<[1], [0], [0], [1], [0, 0, 1, 1], [], []>} : vector<8x16xf32>, vector<16x512xf32>, vector<8x512xf32> -> vector<8x512xf32>
    %14 = vector.broadcast %4 : vector<8x1xf32> to vector<8x512xf32>
    %15 = arith.addf %13, %14 : vector<8x512xf32>
    %cst_10 = arith.constant 0.000000e+00 : f32
    %16 = vector.broadcast %cst_10 : f32 to vector<8x512xf32>
    %17 = arith.maximumf %15, %16 : vector<8x512xf32>
    %c17_i32 = arith.constant 17 : i32
    %18 = tpu.dynamic_rotate %17 by %c17_i32 dim 1 : vector<8x512xf32>, i32 -> vector<8x512xf32>
    %c16_i32 = arith.constant 16 : i32
    %19 = tpu.dynamic_rotate %17 by %c16_i32 dim 1 : vector<8x512xf32>, i32 -> vector<8x512xf32>
    %c15_i32 = arith.constant 15 : i32
    %20 = tpu.dynamic_rotate %17 by %c15_i32 dim 1 : vector<8x512xf32>, i32 -> vector<8x512xf32>
    %c1_i32 = arith.constant 1 : i32
    %21 = tpu.dynamic_rotate %17 by %c1_i32 dim 1 : vector<8x512xf32>, i32 -> vector<8x512xf32>
    %c511_i32 = arith.constant 511 : i32
    %22 = tpu.dynamic_rotate %17 by %c511_i32 dim 1 : vector<8x512xf32>, i32 -> vector<8x512xf32>
    %c497_i32 = arith.constant 497 : i32
    %23 = tpu.dynamic_rotate %17 by %c497_i32 dim 1 : vector<8x512xf32>, i32 -> vector<8x512xf32>
    %c496_i32 = arith.constant 496 : i32
    %24 = tpu.dynamic_rotate %17 by %c496_i32 dim 1 : vector<8x512xf32>, i32 -> vector<8x512xf32>
    %c495_i32 = arith.constant 495 : i32
    %25 = tpu.dynamic_rotate %17 by %c495_i32 dim 1 : vector<8x512xf32>, i32 -> vector<8x512xf32>
    %26 = tpu.concatenate %18, %19, %20, %21, %17, %22, %23, %24, %25 in 0 : vector<8x512xf32>, vector<8x512xf32>, vector<8x512xf32>, vector<8x512xf32>, vector<8x512xf32>, vector<8x512xf32>, vector<8x512xf32>, vector<8x512xf32>, vector<8x512xf32> -> vector<72x512xf32>
    %c0_11 = arith.constant 0 : index
    %c0_12 = arith.constant 0 : index
    %27 = vector.load %arg2[%c0_11, %c0_12] : memref<72x512xf32, #tpu.memory_space<vmem>>, vector<72x512xf32>
    %28 = arith.mulf %26, %27 : vector<72x512xf32>
    %c0_13 = arith.constant 0 : index
    %c0_14 = arith.constant 0 : index
    %29 = vector.load %arg5[%c0_13, %c0_14] : memref<8x72xf32, #tpu.memory_space<vmem>>, vector<8x72xf32>
    %cst_15 = arith.constant dense<0.000000e+00> : vector<8x512xf32>
    %30 = tpu.matmul %29, %28, %cst_15 {dimension_numbers = #tpu.dot_dimension_numbers<[1], [0], [0], [1], [0, 0, 1, 1], [], []>} : vector<8x72xf32>, vector<72x512xf32>, vector<8x512xf32> -> vector<8x512xf32>
    %31 = vector.broadcast %5 : vector<8x1xf32> to vector<8x512xf32>
    %32 = arith.addf %30, %31 : vector<8x512xf32>
    %cst_16 = arith.constant 0.000000e+00 : f32
    %33 = vector.broadcast %cst_16 : f32 to vector<8x512xf32>
    %34 = arith.maximumf %32, %33 : vector<8x512xf32>
    %c0_17 = arith.constant 0 : index
    %c0_18 = arith.constant 0 : index
    %35 = vector.load %arg6[%c0_17, %c0_18] : memref<32x24xf32, #tpu.memory_space<vmem>>, vector<32x24xf32>
    %36 = tpu.concatenate %34, %11 in 0 : vector<8x512xf32>, vector<16x512xf32> -> vector<24x512xf32>
    %cst_19 = arith.constant dense<0.000000e+00> : vector<32x512xf32>
    %37 = tpu.matmul %35, %36, %cst_19 {dimension_numbers = #tpu.dot_dimension_numbers<[1], [0], [0], [1], [0, 0, 1, 1], [], []>} : vector<32x24xf32>, vector<24x512xf32>, vector<32x512xf32> -> vector<32x512xf32>
    %c0_20 = arith.constant 0 : index
    %c0_21 = arith.constant 0 : index
    %c0_22 = arith.constant 0 : index
    %38 = vector.load %arg7[%c0_20, %c0_21, %c0_22] : memref<1x32x512xf32, #tpu.memory_space<vmem>>, vector<1x32x512xf32>
    %39 = vector.shape_cast %38 : vector<1x32x512xf32> to vector<32x512xf32>
    %40 = vector.shape_cast %37 : vector<32x512xf32> to vector<1x32x512xf32>
    tpu.vector_store %arg7[%c0_20, %c0_21, %c0_22], %40 {strides = array<i32>} : memref<1x32x512xf32, #tpu.memory_space<vmem>>, vector<1x32x512xf32>,
    return
  }
  func.func @transform_0(%arg0: i32) -> (i32, i32, i32) {
    %c0_i32 = arith.constant 0 : i32
    %c0_i32_0 = arith.constant 0 : i32
    %c0_i32_1 = arith.constant 0 : i32
    return %arg0, %c0_i32, %c0_i32_0 : i32, i32, i32
  }
  func.func @transform_1(%arg0: i32) -> (i32, i32) {
    %c0_i32 = arith.constant 0 : i32
    %c0_i32_0 = arith.constant 0 : i32
    %c0_i32_1 = arith.constant 0 : i32
    return %c0_i32, %c0_i32_0 : i32, i32
  }
  func.func @transform_2(%arg0: i32) -> (i32, i32) {
    %c0_i32 = arith.constant 0 : i32
    %c0_i32_0 = arith.constant 0 : i32
    %c0_i32_1 = arith.constant 0 : i32
    return %c0_i32, %c0_i32_0 : i32, i32
  }
  func.func @transform_3(%arg0: i32) -> (i32, i32) {
    %c0_i32 = arith.constant 0 : i32
    %c0_i32_0 = arith.constant 0 : i32
    %c0_i32_1 = arith.constant 0 : i32
    return %c0_i32, %c0_i32_0 : i32, i32
  }
  func.func @transform_4(%arg0: i32) -> (i32, i32) {
    %c0_i32 = arith.constant 0 : i32
    %c0_i32_0 = arith.constant 0 : i32
    %c0_i32_1 = arith.constant 0 : i32
    return %c0_i32, %c0_i32_0 : i32, i32
  }
  func.func @transform_5(%arg0: i32) -> (i32, i32) {
    %c0_i32 = arith.constant 0 : i32
    %c0_i32_0 = arith.constant 0 : i32
    %c0_i32_1 = arith.constant 0 : i32
    return %c0_i32, %c0_i32_0 : i32, i32
  }
  func.func @transform_6(%arg0: i32) -> (i32, i32, i32) {
    %c0_i32 = arith.constant 0 : i32
    %c0_i32_0 = arith.constant 0 : i32
    %c0_i32_1 = arith.constant 0 : i32
    return %arg0, %c0_i32, %c0_i32_0 : i32, i32, i32
  }
}

</mosaic_0001>

<bundles_post_ra>
// kernel: residual_block.1
= control target key start
LH: loop header
LB: loop body
LE: loop exit
PB: predicated region body
PF: predicated region fallthrough
CT: control target
= control target key end

     0   :  { %v858_v0 = vmov 0   ;;  %v859_v6 = vmov 0.0   ;;  %vm87_vm0 = vcmask 130048   ;;  %s861_s24 = smov 16   ;;  %s862_s25 = smov 15   ;;  %v245_v62 = vlaneseq  ;;  %s1305_s2 = inlined_call_operand.vmem [shape: f32[48,1], index: 2, kind: input, shape index: {}]   ;;  %s1306_s0 = inlined_call_operand.vmem [shape: f32[1,16,512], index: 0, kind: input, shape index: {}]   ;;  %s1307_s3 = inlined_call_operand.vmem [shape: f32[8,16], index: 3, kind: input, shape index: {}]   ;;  %s1308_s1 = inlined_call_operand.vmem [shape: f32[72,512], index: 1, kind: input, shape index: {}]   ;;  %s1309_s4 = inlined_call_operand.vmem [shape: f32[8,72], index: 4, kind: input, shape index: {}]   ;;  %s1310_s5 = inlined_call_operand.vmem [shape: f32[32,24], index: 5, kind: input, shape index: {}]   ;;  %s1311_s6 = inlined_call_operand.vmem [shape: f32[1,32,512], index: 6, kind: output, shape index: {}]  }
   0x1   :  { %857 = vset.pattern.permute.xlu1 %v858_v0  ;;  %856 = vset.pattern.permute.xlu0 %v858_v0  ;;  %v33_v1 = vld [vmem:[%s1305_s2 + $0x10] sm:$0xff]  ;;  %v31_v2 = vld [vmem:[%s1305_s2] sm:$0xff]  ;;  %v34_v3 = vld [vmem:[%s1305_s2 + $0x18] sm:$0xff]  ;;  %s863_s26 = smov 1   ;;  %s864_s27 = smov 127   ;;  %vm421_vm9 = vcmask 588800  }
   0x2   :  { %57 = vperm.xlu1 %857, %v33_v1   ;;  %39 = vperm.xlu0 %856, %v31_v2   ;;  %v32_v4 = vld [vmem:[%s1305_s2 + $0x8] sm:$0xff]  ;;  %v35_v5 = vld [vmem:[%s1305_s2 + $0x20] sm:$0xff]  ;;  %v25_v8 = vld [vmem:[%s1306_s0 + $0x10] sm:$0xff]  ;;  %s865_s28 = smov 113   ;;  %s866_s29 = smov 112   ;;  %v1032_v0 = vand.u32 127, %v245_v62 }
   0x3   :  { %155 = vmatprep.mubr.f32.mxu0 %v859_v6  ;;  %226 = vmatprep.mubr.f32.mxu1 %v859_v6  ;;  %v23_v7 = vld [vmem:[%s1306_s0] sm:$0xff]  ;;  %v24_v9 = vld [vmem:[%s1306_s0 + $0x8] sm:$0xff]  ;;  %v26_v10 = vld [vmem:[%s1306_s0 + $0x18] sm:$0xff]  ;;  %s867_s30 = smov 111   ;;  %vm575_vm10 = vcmask 195584  }
   0x4   :  { %v27_v16 = vld [vmem:[%s1306_s0 + $0x20] sm:$0xff]  ;;  %v29_v17 = vld [vmem:[%s1306_s0 + $0x30] sm:$0xff]  ;;  %v28_v18 = vld [vmem:[%s1306_s0 + $0x28] sm:$0xff]  ;;  %vm247_vm1 = vcmp.lt.s32.totalorder %v1032_v0, 17  ;;  %vm260_vm2 = vcmp.lt.s32.totalorder %v1032_v0, 16  ;;  %vm273_vm3 = vcmp.lt.s32.totalorder %v1032_v0, 15 }
   0x5   :  { %v30_v20 = vld [vmem:[%s1306_s0 + $0x38] sm:$0xff]  ;;  %v81_v47 = vld [vmem:[%s1307_s3] sm:$0xff]  ;;  %s860_s3 = smov 17   ;;  %v36_v61 = vld [vmem:[%s1305_s2 + $0x28] sm:$0xff]  ;;  %vm286_vm4 = vcmp.lt.s32.totalorder %v1032_v0, 1  ;;  %vm299_vm5 = vcmp.lt.s32.totalorder %v1032_v0, 127 }
   0x6   :  { %62 = vperm.xlu1 %857, %v34_v3   ;;  %44 = vperm.xlu0 %856, %v32_v4   ;;  %v344_v4 = vld [vmem:[%s1308_s1 + $0x8] sm:$0xff]  ;;  %vm312_vm6 = vcmp.lt.s32.totalorder %v1032_v0, 113  ;;  %vm325_vm7 = vcmp.lt.s32.totalorder %v1032_v0, 112  ;;  %vm338_vm8 = vcmp.lt.s32.totalorder %v1032_v0, 111 }
   0xa   :  { %84 = vperm.xlu0 %856, %v35_v5  }
  0x81   :  { %v58_v11 = vpop.permute.xlu1 %57  ;;  %v40_v12 = vpop.permute.xlu0 %39 }
  0x82   :  { %v47_v13 = vmul.f32 %v40_v12, %v23_v7  ;;  %v49_v14 = vmul.f32 %v40_v12, %v25_v8  ;;  %v48_v15 = vmul.f32 %v40_v12, %v24_v9  ;;  %v50_v19 = vmul.f32 %v40_v12, %v26_v10  ;;  %v348_v8 = vld [vmem:[%s1308_s1 + $0x28] sm:$0xff]  ;;  %v343_v12 = vld [vmem:[%s1308_s1] sm:$0xff] }
  0x84   :  { %v944_v22 = vadd.f32 %v58_v11, %v48_v15  ;;  %v946_v23 = vadd.f32 %v58_v11, %v47_v13  ;;  %v948_v27 = vadd.f32 %v58_v11, %v49_v14  ;;  %v950_v30 = vadd.f32 %v58_v11, %v50_v19  ;;  %v349_v14 = vld [vmem:[%s1308_s1 + $0x30] sm:$0xff]  ;;  %v346_v15 = vld [vmem:[%s1308_s1 + $0x18] sm:$0xff]  ;;  %v347_v19 = vld [vmem:[%s1308_s1 + $0x20] sm:$0xff] }
  0x85   :  { %v45_v21 = vpop.permute.xlu0 %44  ;;  %v63_v28 = vpop.permute.xlu1 %62 }
  0x86   :  { %v51_v24 = vmul.f32 %v45_v21, %v27_v16  ;;  %v53_v25 = vmul.f32 %v45_v21, %v29_v17  ;;  %v52_v26 = vmul.f32 %v45_v21, %v28_v18  ;;  %v54_v29 = vmul.f32 %v45_v21, %v30_v20  ;;  %v350_v20 = vld [vmem:[%s1308_s1 + $0x38] sm:$0xff]  ;;  %v345_v21 = vld [vmem:[%s1308_s1 + $0x10] sm:$0xff] }
  0x87   :  { %v74_v34 = vmax.f32 %v944_v22, 0.0  ;;  %v73_v36 = vmax.f32 %v946_v23, 0.0  ;;  %v75_v39 = vmax.f32 %v948_v27, 0.0  ;;  %v76_v41 = vmax.f32 %v950_v30, 0.0  ;;  %v571_v22 = vld [vmem:[%s1310_s5] sm:$0xff]  ;;  %v572_v23 = vld [vmem:[%s1310_s5 + $0x8] sm:$0xff] }
  0x88   :  { %v952_v31 = vadd.f32 %v63_v28, %v52_v26  ;;  %v954_v32 = vadd.f32 %v63_v28, %v51_v24  ;;  %v956_v33 = vadd.f32 %v63_v28, %v53_v25  ;;  %v959_v35 = vadd.f32 %v63_v28, %v54_v29  ;;  %v573_v27 = vld [vmem:[%s1310_s5 + $0x10] sm:$0xff]  ;;  %v574_v30 = vld [vmem:[%s1310_s5 + $0x18] sm:$0xff] }
  0x89   :  { %v85_v48 = vpop.permute.xlu0 %84 }
  0x8a   :  { %v78_v37 = vmax.f32 %v952_v31, 0.0  ;;  %v77_v38 = vmax.f32 %v954_v32, 0.0  ;;  %v79_v40 = vmax.f32 %v956_v33, 0.0  ;;  %v80_v42 = vmax.f32 %v959_v35, 0.0 }
  0x8c   :  { %v798_v43 = vpack.c.bf16 %v78_v37, %v74_v34  ;;  %v800_v44 = vpack.c.bf16 %v77_v38, %v73_v36  ;;  %v804_v45 = vpack.c.bf16 %v79_v40, %v75_v39  ;;  %v802_v46 = vpack.c.bf16 %v80_v42, %v76_v41 }
  0x8e   :  { %799 = vmatprep.subr.bf16.mxu0 %v798_v43  ;;  %803 = vmatprep.subr.bf16.mxu1 %v802_v46 }
  0x8f   :  { %801 = vmatpush1.bf16.msra.mxu0 %v800_v44  ;;  %805 = vmatpush1.bf16.msra.mxu1 %v804_v45 }
  0x92   :  { %786 = vmatmul.mubr.msk.f32.vlgmr.msra.gmra.mrb[0].mxu0 %vm87_vm0, %v81_v47  ;;  %787 = vmatmul.mubr.msk.f32.vlgmr.msra.gmra.mrb[0].mxu1 %vm87_vm0, %v81_v47 }
  0x93   :  { %489 = vmatprep.mubr.f32.mxu0 %v859_v6  ;;  %560 = vmatprep.mubr.f32.mxu1 %v859_v6 }
 0x165   :  { %v157_v49 = vpop.f32.mrb[0].mxu0  ;;  %v228_v51 = vpop.f32.mrb[0].mxu1 }
 0x166   :  { %v158_v50 = vadd.f32 %v157_v49, %v85_v48  ;;  %v159_v52 = vpop.f32.mrb[1].mxu0  ;;  %v230_v54 = vpop.f32.mrb[1].mxu1  ;;  %v229_v56 = vadd.f32 %v228_v51, %v85_v48 }
 0x167   :  { %v160_v53 = vadd.f32 %v159_v52, %v85_v48  ;;  %v231_v58 = vadd.f32 %v230_v54, %v85_v48 }
 0x168   :  { %v989_v55 = vmax.f32 %v158_v50, 0.0  ;;  %v995_v59 = vmax.f32 %v229_v56, 0.0 }
 0x169   :  { %v991_v57 = vmax.f32 %v160_v53, 0.0  ;;  %v997_v60 = vmax.f32 %v231_v58, 0.0 }
 0x16a   :  { %237 = vrot.lane.b32.xlu1 %v989_v55, %s860_s3 }
 0x16b   :  { %239 = vrot.lane.b32.xlu0 %v991_v57, %s860_s3 }
 0x16e   :  { %241 = vrot.lane.b32.xlu1 %v995_v59, %s860_s3 }
 0x16f   :  { %243 = vrot.lane.b32.xlu0 %v997_v60, %s860_s3 }
 0x172   :  { %252 = vrot.lane.b32.xlu1 %v989_v55, %s861_s24 }
 0x173   :  { %254 = vrot.lane.b32.xlu0 %v991_v57, %s861_s24 }
 0x176   :  { %256 = vrot.lane.b32.xlu1 %v995_v59, %s861_s24 }
 0x177   :  { %258 = vrot.lane.b32.xlu0 %v997_v60, %s861_s24 }
 0x17a   :  { %265 = vrot.lane.b32.xlu1 %v989_v55, %s862_s25 }
 0x17b   :  { %267 = vrot.lane.b32.xlu0 %v991_v57, %s862_s25 }
 0x17e   :  { %269 = vrot.lane.b32.xlu1 %v995_v59, %s862_s25 }
 0x17f   :  { %271 = vrot.lane.b32.xlu0 %v997_v60, %s862_s25 }
 0x182   :  { %278 = vrot.lane.b32.xlu1 %v989_v55, %s863_s26 }
 0x183   :  { %280 = vrot.lane.b32.xlu0 %v991_v57, %s863_s26 }
 0x186   :  { %282 = vrot.lane.b32.xlu1 %v995_v59, %s863_s26 }
 0x187   :  { %284 = vrot.lane.b32.xlu0 %v997_v60, %s863_s26 }
 0x18a   :  { %291 = vrot.lane.b32.xlu1 %v989_v55, %s864_s27 }
 0x18b   :  { %293 = vrot.lane.b32.xlu0 %v991_v57, %s864_s27 }
 0x18e   :  { %295 = vrot.lane.b32.xlu1 %v995_v59, %s864_s27 }
 0x18f   :  { %297 = vrot.lane.b32.xlu0 %v997_v60, %s864_s27 }
 0x192   :  { %304 = vrot.lane.b32.xlu1 %v989_v55, %s865_s28 }
 0x193   :  { %306 = vrot.lane.b32.xlu0 %v991_v57, %s865_s28 }
 0x196   :  { %308 = vrot.lane.b32.xlu1 %v995_v59, %s865_s28 }
 0x197   :  { %310 = vrot.lane.b32.xlu0 %v997_v60, %s865_s28 }
 0x19a   :  { %317 = vrot.lane.b32.xlu1 %v989_v55, %s866_s29 }
 0x19b   :  { %319 = vrot.lane.b32.xlu0 %v991_v57, %s866_s29 }
 0x19e   :  { %321 = vrot.lane.b32.xlu1 %v995_v59, %s866_s29 }
 0x19f   :  { %323 = vrot.lane.b32.xlu0 %v997_v60, %s866_s29 }
 0x1a2   :  { %330 = vrot.lane.b32.xlu1 %v989_v55, %s867_s30 }
 0x1a3   :  { %332 = vrot.lane.b32.xlu0 %v991_v57, %s867_s30 }
 0x1a6   :  { %334 = vrot.lane.b32.xlu1 %v995_v59, %s867_s30 }
 0x1a7   :  { %336 = vrot.lane.b32.xlu0 %v997_v60, %s867_s30 }
 0x1aa   :  { %418 = vperm.xlu1 %857, %v36_v61   ;;  %v352_v61 = vld [vmem:[%s1308_s1 + $0x48] sm:$0xff] }
 0x1dc   :  { %v238_v63 = vpop.permute.xlu1 %237 }
 0x1dd   :  { %v240_v1 = vpop.permute.xlu0 %239 }
 0x1de   :  { %v250_v5 = vsel %vm247_vm1, %v238_v63, %v240_v1 }
 0x1df   :  { %v380_v11 = vmul.f32 %v344_v4, %v250_v5  ;;  %v351_v5 = vld [vmem:[%s1308_s1 + $0x40] sm:$0xff] }
 0x1e0   :  { %v242_v2 = vpop.permute.xlu1 %241 }
 0x1e1   :  { %v244_v3 = vpop.permute.xlu0 %243  ;;  %v249_v24 = vsel %vm247_vm1, %v240_v1, %v242_v2  ;;  %v356_v1 = vld [vmem:[%s1308_s1 + $0x68] sm:$0xff] }
 0x1e2   :  { %v248_v16 = vsel %vm247_vm1, %v242_v2, %v244_v3  ;;  %v251_v17 = vsel %vm247_vm1, %v244_v3, %v238_v63  ;;  %v381_v49 = vmul.f32 %v345_v21, %v249_v24 }
 0x1e3   :  { %v379_v45 = vmul.f32 %v343_v12, %v251_v17  ;;  %v382_v46 = vmul.f32 %v346_v15, %v248_v16  ;;  %v353_v15 = vld [vmem:[%s1308_s1 + $0x50] sm:$0xff] }
 0x1e4   :  { %v253_v7 = vpop.permute.xlu1 %252 }
 0x1e5   :  { %v255_v9 = vpop.permute.xlu0 %254 }
 0x1e6   :  { %v263_v10 = vsel %vm260_vm2, %v253_v7, %v255_v9 }
 0x1e7   :  { %v384_v13 = vmul.f32 %v348_v8, %v263_v10  ;;  %v357_v8 = vld [vmem:[%s1308_s1 + $0x70] sm:$0xff] }
 0x1e8   :  { %v257_v18 = vpop.permute.xlu1 %256 }
 0x1e9   :  { %v262_v25 = vsel %vm260_vm2, %v255_v9, %v257_v18  ;;  %v259_v26 = vpop.permute.xlu0 %258  ;;  %v806_v28 = vpack.c.bf16 %v384_v13, %v380_v11  ;;  %v354_v9 = vld [vmem:[%s1308_s1 + $0x58] sm:$0xff]  ;;  %v355_v13 = vld [vmem:[%s1308_s1 + $0x60] sm:$0xff] }
 0x1ea   :  { %v385_v29 = vmul.f32 %v349_v14, %v262_v25  ;;  %v261_v43 = vsel %vm260_vm2, %v257_v18, %v259_v26  ;;  %v264_v44 = vsel %vm260_vm2, %v259_v26, %v253_v7  ;;  %v358_v14 = vld [vmem:[%s1308_s1 + $0x78] sm:$0xff] }
 0x1eb   :  { %v383_v47 = vmul.f32 %v347_v19, %v264_v44  ;;  %v386_v48 = vmul.f32 %v350_v20, %v261_v43  ;;  %807 = vmatprep.subr.bf16.mxu0 %v806_v28 }
 0x1ec   :  { %v266_v50 = vpop.permute.xlu1 %265  ;;  %v824_v54 = vpack.c.bf16 %v385_v29, %v381_v49  ;;  %v359_v49 = vld [vmem:[%s1308_s1 + $0x80] sm:$0xff] }
 0x1ed   :  { %v808_v51 = vpack.c.bf16 %v383_v47, %v379_v45  ;;  %v268_v52 = vpop.permute.xlu0 %267  ;;  %v822_v53 = vpack.c.bf16 %v386_v48, %v382_v46 }
 0x1ee   :  { %v276_v62 = vsel %vm273_vm3, %v266_v50, %v268_v52 }
 0x1ef   :  { %809 = vmatpush1.bf16.msra.mxu0 %v808_v51  ;;  %823 = vmatprep.subr.bf16.mxu1 %v822_v53  ;;  %v388_v4 = vmul.f32 %v352_v61, %v276_v62  ;;  %v361_v53 = vld [vmem:[%s1308_s1 + $0x90] sm:$0xff]  ;;  %v366_v61 = vld [vmem:[%s1308_s1 + $0xb8] sm:$0xff] }
 0x1f0   :  { %825 = vmatpush1.bf16.msra.mxu1 %v824_v54  ;;  %v270_v56 = vpop.permute.xlu1 %269  ;;  %v360_v54 = vld [vmem:[%s1308_s1 + $0x88] sm:$0xff]  ;;  %v362_v62 = vld [vmem:[%s1308_s1 + $0x98] sm:$0xff] }
 0x1f1   :  { %v272_v58 = vpop.permute.xlu0 %271  ;;  %v275_v16 = vsel %vm273_vm3, %v268_v52, %v270_v56  ;;  %v364_v52 = vld [vmem:[%s1308_s1 + $0xa8] sm:$0xff] }
 0x1f2   :  { %v274_v10 = vsel %vm273_vm3, %v270_v56, %v272_v58  ;;  %v277_v11 = vsel %vm273_vm3, %v272_v58, %v266_v50  ;;  %v389_v43 = vmul.f32 %v353_v15, %v275_v16  ;;  %v363_v50 = vld [vmem:[%s1308_s1 + $0xa0] sm:$0xff]  ;;  %v365_v58 = vld [vmem:[%s1308_s1 + $0xb0] sm:$0xff] }
 0x1f3   :  { %v387_v25 = vmul.f32 %v351_v5, %v277_v11  ;;  %v390_v26 = vmul.f32 %v354_v9, %v274_v10  ;;  %v397_v9 = vmul.f32 %v361_v53, %v995_v59 }
 0x1f4   :  { %v279_v63 = vpop.permute.xlu1 %278 }
 0x1f5   :  { %v281_v2 = vpop.permute.xlu0 %280 }
 0x1f6   :  { %v289_v3 = vsel %vm286_vm4, %v279_v63, %v281_v2 }
 0x1f7   :  { %v392_v7 = vmul.f32 %v356_v1, %v289_v3 }
 0x1f8   :  { %v283_v12 = vpop.permute.xlu1 %282 }
 0x1f9   :  { %v288_v17 = vsel %vm286_vm4, %v281_v2, %v283_v12  ;;  %v285_v18 = vpop.permute.xlu0 %284  ;;  %v810_v19 = vpack.c.bf16 %v392_v7, %v388_v4 }
 0x1fa   :  { %v393_v20 = vmul.f32 %v357_v8, %v288_v17  ;;  %v287_v21 = vsel %vm286_vm4, %v283_v12, %v285_v18  ;;  %v290_v24 = vsel %vm286_vm4, %v285_v18, %v279_v63  ;;  %v395_v63 = vmul.f32 %v359_v49, %v989_v55 }
 0x1fb   :  { %v391_v28 = vmul.f32 %v355_v13, %v290_v24  ;;  %v394_v29 = vmul.f32 %v358_v14, %v287_v21  ;;  %811 = vmatprep.subr.bf16.mxu0 %v810_v19  ;;  %v396_v8 = vmul.f32 %v360_v54, %v991_v57  ;;  %v398_v55 = vmul.f32 %v362_v62, %v997_v60  ;;  %v367_v60 = vld [vmem:[%s1308_s1 + $0xc0] sm:$0xff] }
 0x1fc   :  { %v292_v44 = vpop.permute.xlu1 %291  ;;  %v828_v48 = vpack.c.bf16 %v393_v20, %v389_v43  ;;  %v371_v21 = vld [vmem:[%s1308_s1 + $0xe0] sm:$0xff]  ;;  %v370_v43 = vld [vmem:[%s1308_s1 + $0xd8] sm:$0xff] }
 0x1fd   :  { %v812_v45 = vpack.c.bf16 %v391_v28, %v387_v25  ;;  %v294_v46 = vpop.permute.xlu0 %293  ;;  %v826_v47 = vpack.c.bf16 %v394_v29, %v390_v26  ;;  %v368_v25 = vld [vmem:[%s1308_s1 + $0xc8] sm:$0xff]  ;;  %v369_v28 = vld [vmem:[%s1308_s1 + $0xd0] sm:$0xff] }
 0x1fe   :  { %v302_v51 = vsel %vm299_vm5, %v292_v44, %v294_v46  ;;  %v372_v29 = vld [vmem:[%s1308_s1 + $0xe8] sm:$0xff] }
 0x1ff   :  { %813 = vmatpush1.bf16.msra.mxu0 %v812_v45  ;;  %827 = vmatprep.subr.bf16.mxu1 %v826_v47  ;;  %v399_v1 = vmul.f32 %v363_v50, %v302_v51  ;;  %v373_v47 = vld [vmem:[%s1308_s1 + $0xf0] sm:$0xff] }
 0x200   :  { %829 = vmatpush1.bf16.msra.mxu1 %v828_v48  ;;  %v296_v56 = vpop.permute.xlu1 %295  ;;  %v374_v48 = vld [vmem:[%s1308_s1 + $0xf8] sm:$0xff] }
 0x201   :  { %v301_v2 = vsel %vm299_vm5, %v294_v46, %v296_v56  ;;  %v298_v3 = vpop.permute.xlu0 %297  ;;  %v816_v14 = vpack.c.bf16 %v399_v1, %v395_v63 }
 0x202   :  { %v400_v4 = vmul.f32 %v364_v52, %v301_v2  ;;  %v300_v5 = vsel %vm299_vm5, %v296_v56, %v298_v3  ;;  %v303_v7 = vsel %vm299_vm5, %v298_v3, %v292_v44 }
 0x203   :  { %v401_v10 = vmul.f32 %v365_v58, %v300_v5  ;;  %v402_v11 = vmul.f32 %v366_v61, %v303_v7 }
 0x204   :  { %v305_v12 = vpop.permute.xlu1 %304  ;;  %v814_v13 = vpack.c.bf16 %v400_v4, %v396_v8 }
 0x205   :  { %v832_v15 = vpack.c.bf16 %v401_v10, %v397_v9  ;;  %v307_v16 = vpop.permute.xlu0 %306  ;;  %v830_v17 = vpack.c.bf16 %v402_v11, %v398_v55  ;;  %v376_v9 = vld [vmem:[%s1308_s1 + $0x108] sm:$0xff]  ;;  %v375_v10 = vld [vmem:[%s1308_s1 + $0x100] sm:$0xff] }
 0x206   :  { %815 = vmatprep.subr.bf16.mxu0 %v814_v13  ;;  %v315_v20 = vsel %vm312_vm6, %v305_v12, %v307_v16  ;;  %v378_v13 = vld [vmem:[%s1308_s1 + $0x118] sm:$0xff] }
 0x207   :  { %817 = vmatpush1.bf16.msra.mxu0 %v816_v14  ;;  %831 = vmatprep.subr.bf16.mxu1 %v830_v17  ;;  %v403_v49 = vmul.f32 %v367_v60, %v315_v20  ;;  %v415_v60 = vld [vmem:[%s1309_s4] sm:$0xff] }
 0x208   :  { %833 = vmatpush1.bf16.msra.mxu1 %v832_v15  ;;  %v309_v18 = vpop.permute.xlu1 %308 }
 0x209   :  { %v311_v19 = vpop.permute.xlu0 %310  ;;  %v314_v26 = vsel %vm312_vm6, %v307_v16, %v309_v18 }
 0x20a   :  { %v313_v44 = vsel %vm312_vm6, %v309_v18, %v311_v19  ;;  %v316_v45 = vsel %vm312_vm6, %v311_v19, %v305_v12  ;;  %v404_v53 = vmul.f32 %v368_v25, %v314_v26  ;;  %v377_v12 = vld [vmem:[%s1308_s1 + $0x110] sm:$0xff] }
 0x20b   :  { %v405_v61 = vmul.f32 %v369_v28, %v313_v44  ;;  %v406_v62 = vmul.f32 %v370_v43, %v316_v45 }
 0x20c   :  { %v318_v57 = vpop.permute.xlu1 %317 }
 0x20d   :  { %v320_v59 = vpop.permute.xlu0 %319 }
 0x20e   :  { %v328_v24 = vsel %vm325_vm7, %v318_v57, %v320_v59 }
 0x20f   :  { %v407_v50 = vmul.f32 %v371_v21, %v328_v24 }
 0x210   :  { %v322_v46 = vpop.permute.xlu1 %321 }
 0x211   :  { %v327_v51 = vsel %vm325_vm7, %v320_v59, %v322_v46  ;;  %v324_v52 = vpop.permute.xlu0 %323  ;;  %v820_v4 = vpack.c.bf16 %v407_v50, %v403_v49 }
 0x212   :  { %v408_v54 = vmul.f32 %v372_v29, %v327_v51  ;;  %v326_v56 = vsel %vm325_vm7, %v322_v46, %v324_v52  ;;  %v329_v58 = vsel %vm325_vm7, %v324_v52, %v318_v57 }
 0x213   :  { %v409_v63 = vmul.f32 %v373_v47, %v326_v56  ;;  %v410_v1 = vmul.f32 %v374_v48, %v329_v58 }
 0x214   :  { %v331_v2 = vpop.permute.xlu1 %330  ;;  %v818_v3 = vpack.c.bf16 %v408_v54, %v404_v53 }
 0x215   :  { %v836_v5 = vpack.c.bf16 %v409_v63, %v405_v61  ;;  %v333_v7 = vpop.permute.xlu0 %332  ;;  %v834_v8 = vpack.c.bf16 %v410_v1, %v406_v62 }
 0x216   :  { %819 = vmatprep.subr.bf16.mxu0 %v818_v3  ;;  %v341_v11 = vsel %vm338_vm8, %v331_v2, %v333_v7 }
 0x217   :  { %821 = vmatpush1.bf16.msra.mxu0 %v820_v4  ;;  %835 = vmatprep.subr.bf16.mxu1 %v834_v8  ;;  %v411_v19 = vmul.f32 %v375_v10, %v341_v11 }
 0x218   :  { %837 = vmatpush1.bf16.msra.mxu1 %v836_v5  ;;  %v335_v55 = vpop.permute.xlu1 %334 }
 0x219   :  { %v340_v14 = vsel %vm338_vm8, %v333_v7, %v335_v55  ;;  %v337_v15 = vpop.permute.xlu0 %336 }
 0x21a   :  { %v412_v16 = vmul.f32 %v376_v9, %v340_v14  ;;  %v339_v17 = vsel %vm338_vm8, %v335_v55, %v337_v15  ;;  %v342_v18 = vsel %vm338_vm8, %v337_v15, %v331_v2 }
 0x21b   :  { %v413_v57 = vmul.f32 %v377_v12, %v339_v17  ;;  %v414_v59 = vmul.f32 %v378_v13, %v342_v18 }
 0x21c   :  { %441 = vmatprep.subr.mxu0 %v412_v16 }
 0x21d   :  { %442 = vmatpush1.msra.mxu0 %v411_v19  ;;  %512 = vmatprep.subr.mxu1 %v414_v59 }
 0x21e   :  { %788 = vmatmul.mubr.msk.f32.vlgmr.msra.gmra.mrb[2].mxu0 %vm421_vm9, %v415_v60  ;;  %513 = vmatpush1.msra.mxu1 %v413_v57 }
 0x21f   :  { %789 = vmatmul.mubr.msk.f32.vlgmr.msra.gmra.mrb[2].mxu1 %vm421_vm9, %v415_v60  ;;  %652 = vmatprep.mubr.f32.mxu0 %v859_v6 }
 0x220   :  { %741 = vmatprep.mubr.f32.mxu1 %v859_v6 }
 0x229   :  { %v419_v0 = vpop.permute.xlu1 %418 }
 0x2f1   :  { %v491_v20 = vpop.f32.mrb[2].mxu0 }
 0x2f2   :  { %v492_v21 = vadd.f32 %v491_v20, %v419_v0  ;;  %v493_v24 = vpop.f32.mrb[3].mxu0  ;;  %v562_v25 = vpop.f32.mrb[2].mxu1 }
 0x2f3   :  { %v494_v26 = vadd.f32 %v493_v24, %v419_v0  ;;  %v563_v28 = vadd.f32 %v562_v25, %v419_v0  ;;  %v564_v29 = vpop.f32.mrb[3].mxu1 }
 0x2f4   :  { %v567_v43 = vmax.f32 %v492_v21, 0.0  ;;  %v565_v44 = vadd.f32 %v564_v29, %v419_v0 }
 0x2f5   :  { %v568_v45 = vmax.f32 %v494_v26, 0.0  ;;  %v569_v46 = vmax.f32 %v563_v28, 0.0 }
 0x2f6   :  { %v570_v47 = vmax.f32 %v565_v44, 0.0  ;;  %v840_v49 = vpack.c.bf16 %v73_v36, %v567_v43 }
 0x2f7   :  { %v838_v48 = vpack.c.bf16 %v74_v34, %v568_v45  ;;  %v844_v51 = vpack.c.bf16 %v75_v39, %v569_v46 }
 0x2f8   :  { %v842_v50 = vpack.c.bf16 %v76_v41, %v570_v47 }
 0x2f9   :  { %839 = vmatprep.subr.bf16.mxu0 %v838_v48 }
 0x2fa   :  { %841 = vmatpush1.bf16.msra.mxu0 %v840_v49  ;;  %843 = vmatprep.subr.bf16.mxu1 %v842_v50 }
 0x2fb   :  { %592 = vmatprep.subr.mxu0 %v78_v37  ;;  %845 = vmatpush1.bf16.msra.mxu1 %v844_v51 }
 0x2fc   :  { %681 = vmatprep.subr.mxu1 %v80_v42 }
 0x2fe   :  { %593 = vmatpush1.msra.mxu0 %v77_v38 }
 0x2ff   :  { %682 = vmatpush1.msra.mxu1 %v79_v40  ;;  %790 = vmatmul.mubr.msk.f32.vlgmr.msra.gmra.mrb[4].mxu0 %vm575_vm10, %v571_v22 }
 0x300   :  { %794 = vmatmul.mubr.msk.f32.vlgmr.msra.gmra.mrb[4].mxu1 %vm575_vm10, %v571_v22  ;;  %658 = vmatprep.mubr.f32.mxu0 %v859_v6 }
 0x301   :  { %747 = vmatprep.mubr.f32.mxu1 %v859_v6 }
 0x303   :  { %791 = vmatmul.mubr.msk.f32.gmra.mrb[6].mxu0 %vm575_vm10, %v572_v23 }
 0x304   :  { %795 = vmatmul.mubr.msk.f32.gmra.mrb[6].mxu1 %vm575_vm10, %v572_v23  ;;  %664 = vmatprep.mubr.f32.mxu0 %v859_v6 }
 0x305   :  { %753 = vmatprep.mubr.f32.mxu1 %v859_v6 }
 0x307   :  { %792 = vmatmul.mubr.msk.f32.gmra.mrb[8].mxu0 %vm575_vm10, %v573_v27 }
 0x308   :  { %796 = vmatmul.mubr.msk.f32.gmra.mrb[8].mxu1 %vm575_vm10, %v573_v27  ;;  %670 = vmatprep.mubr.f32.mxu0 %v859_v6 }
 0x309   :  { %759 = vmatprep.mubr.f32.mxu1 %v859_v6 }
 0x30b   :  { %793 = vmatmul.mubr.msk.f32.gmra.mrb[10].mxu0 %vm575_vm10, %v574_v30 }
 0x30c   :  { %797 = vmatmul.mubr.msk.f32.gmra.mrb[10].mxu1 %vm575_vm10, %v574_v30 }
 0x3d2   :  { %v654_v31 = vpop.f32.mrb[4].mxu0 }
 0x3d3   :  { %766 = vst [vmem:[%s1311_s6] sm:$0xff] %v654_v31  ;;  %v743_v32 = vpop.f32.mrb[4].mxu1  ;;  %v656_v33 = vpop.f32.mrb[5].mxu0 }
 0x3d4   :  { %768 = vst [vmem:[%s1311_s6 + $0x10] sm:$0xff] %v743_v32  ;;  %767 = vst [vmem:[%s1311_s6 + $0x8] sm:$0xff] %v656_v33  ;;  %v745_v6 = vpop.f32.mrb[5].mxu1 }
 0x3d5   :  { %769 = vst [vmem:[%s1311_s6 + $0x18] sm:$0xff] %v745_v6 }
 0x3d6   :  { %v660_v34 = vpop.f32.mrb[6].mxu0 }
 0x3d7   :  { %770 = vst [vmem:[%s1311_s6 + $0x20] sm:$0xff] %v660_v34  ;;  %v749_v35 = vpop.f32.mrb[6].mxu1  ;;  %v662_v36 = vpop.f32.mrb[7].mxu0 }
 0x3d8   :  { %772 = vst [vmem:[%s1311_s6 + $0x30] sm:$0xff] %v749_v35  ;;  %771 = vst [vmem:[%s1311_s6 + $0x28] sm:$0xff] %v662_v36  ;;  %v751_v37 = vpop.f32.mrb[7].mxu1 }
 0x3d9   :  { %773 = vst [vmem:[%s1311_s6 + $0x38] sm:$0xff] %v751_v37 }
 0x3da   :  { %v666_v38 = vpop.f32.mrb[8].mxu0 }
 0x3db   :  { %774 = vst [vmem:[%s1311_s6 + $0x40] sm:$0xff] %v666_v38  ;;  %v755_v39 = vpop.f32.mrb[8].mxu1  ;;  %v668_v40 = vpop.f32.mrb[9].mxu0 }
 0x3dc   :  { %776 = vst [vmem:[%s1311_s6 + $0x50] sm:$0xff] %v755_v39  ;;  %775 = vst [vmem:[%s1311_s6 + $0x48] sm:$0xff] %v668_v40  ;;  %v757_v41 = vpop.f32.mrb[9].mxu1 }
 0x3dd   :  { %777 = vst [vmem:[%s1311_s6 + $0x58] sm:$0xff] %v757_v41 }
 0x3de   :  { %v672_v42 = vpop.f32.mrb[10].mxu0 }
 0x3df   :  { %778 = vst [vmem:[%s1311_s6 + $0x60] sm:$0xff] %v672_v42  ;;  %v761_v52 = vpop.f32.mrb[10].mxu1  ;;  %v674_v53 = vpop.f32.mrb[11].mxu0 }
 0x3e0   :  { %780 = vst [vmem:[%s1311_s6 + $0x70] sm:$0xff] %v761_v52  ;;  %779 = vst [vmem:[%s1311_s6 + $0x68] sm:$0xff] %v674_v53  ;;  %v763_v54 = vpop.f32.mrb[11].mxu1 }
 0x3e1   :  { %781 = vst [vmem:[%s1311_s6 + $0x78] sm:$0xff] %v763_v54 }

</bundles_post_ra>
